<compile_context>
chip_gen: v6e
topology: v6e:2x2x1
jax: 0.10.0
libtpu: 0.0.40
codegen_flags: <defaults>
</compile_context>

<pallas_src>
import functools

import jax
import jax.numpy as jnp
from jax.experimental import pallas as pl
from jax.experimental.pallas import tpu as pltpu


def _round_up(x: int, m: int) -> int:
    return ((x + m - 1) // m) * m


def _sublane_min(dtype) -> int:
    # Minimum second-to-last block dim by element width: 8 (4B), 16 (2B), 32 (1B).
    return max(8, 32 // jnp.dtype(dtype).itemsize)


def _linear_kernel_inplace(x_ref, w_ref, b_ref, o_ref, *, cast_bf16):
    """f32-output path: accumulate straight into the resident output block."""
    k = pl.program_id(2)

    @pl.when(k == 0)
    def _():
        o_ref[...] = jnp.zeros_like(o_ref)

    xv = x_ref[...]
    wv = w_ref[...]
    if cast_bf16:
        xv = xv.astype(jnp.bfloat16)
        wv = wv.astype(jnp.bfloat16)

    # Contract x's Fin (dim 1) against W's Fin (dim 1) -> (tm, tn) on the MXU;
    # no explicit W.T copy in VMEM.
    o_ref[...] += jax.lax.dot_general(
        xv, wv,
        dimension_numbers=(((1,), (1,)), ((), ())),
        preferred_element_type=jnp.float32,
    )

    @pl.when(k == pl.num_programs(2) - 1)
    def _():
        # Bias added exactly once, after the last K block.
        o_ref[...] += b_ref[...].astype(o_ref.dtype)


def _linear_kernel_scratch(x_ref, w_ref, b_ref, o_ref, acc_ref, *, cast_bf16):
    """Low-precision-output path: f32 VMEM accumulator, cast at finalize."""
    k = pl.program_id(2)

    @pl.when(k == 0)
    def _():
        acc_ref[...] = jnp.zeros_like(acc_ref)

    xv = x_ref[...]
    wv = w_ref[...]
    if cast_bf16:
        xv = xv.astype(jnp.bfloat16)
        wv = wv.astype(jnp.bfloat16)

    acc_ref[...] += jax.lax.dot_general(
        xv, wv,
        dimension_numbers=(((1,), (1,)), ((), ())),
        preferred_element_type=jnp.float32,
    )

    @pl.when(k == pl.num_programs(2) - 1)
    def _():
        o_ref[...] = (acc_ref[...] + b_ref[...].astype(jnp.float32)).astype(o_ref.dtype)


def _pick_tiles(B, Fin, Fout, sub_min, op_itemsize, out_itemsize):
    """Tile plan: as big as fits a conservative VMEM budget (v7x-safe)."""
    tm = min(512, _round_up(B, sub_min))
    tk_cap = 1024 if Fin >= 1024 else 512
    tk = min(tk_cap, _round_up(Fin, 128))
    tn = min(512, _round_up(Fout, 128))

    # v7x megacore: with a single M block, make sure the N axis has >= 2
    # parallel blocks (when Fout allows) so both TensorCores get work.
    m_blocks = -(-B // tm)
    if m_blocks == 1:
        np128 = _round_up(Fout, 128)
        if np128 >= 256:
            tn = min(tn, max(128, (np128 // 2 // 128) * 128))

    def footprint(tm_, tk_, tn_):
        streamed = 2 * (tm_ * tk_ + tn_ * tk_) * op_itemsize  # double-buffered x, W
        out = 2 * tm_ * tn_ * out_itemsize                    # double-buffered output
        acc = tm_ * tn_ * 4                                    # f32 scratch (worst case)
        bias = 2 * tn_ * 4
        return streamed + out + acc + bias

    budget = 40 << 20  # leaves headroom on v7x's 64 MiB physical VMEM
    while footprint(tm, tk, tn) > budget and tk > 128:
        tk = max(128, (tk // 2 // 128) * 128)
    while footprint(tm, tk, tn) > budget and tn > 128:
        tn = max(128, (tn // 2 // 128) * 128)
    while footprint(tm, tk, tn) > budget and tm > sub_min:
        tm = max(sub_min, (tm // 2 // sub_min) * sub_min)

    return tm, tk, tn, footprint(tm, tk, tn)


@functools.partial(jax.jit, static_argnames=("use_bf16_operands",))
def linear_forward(x, w, b, *, use_bf16_operands=False):
    """Pallas TPU linear layer: y = x @ W^T + b (torch.nn.Linear forward)."""
    B, Fin = x.shape
    Fout = w.shape[0]
    out_dtype = x.dtype

    op_dtype = jnp.bfloat16 if use_bf16_operands else x.dtype
    op_itemsize = jnp.dtype(op_dtype).itemsize
    out_itemsize = jnp.dtype(out_dtype).itemsize
    sub_min = _sublane_min(op_dtype)

    tm, tk, tn, fp_bytes = _pick_tiles(B, Fin, Fout, sub_min, op_itemsize, out_itemsize)

    Bp = _round_up(B, tm)
    Kp = _round_up(Fin, tk)
    Np = _round_up(Fout, tn)

    # Pad only the dims that need it (zero padding on Fin adds nothing to the
    # accumulation); aligned shapes skip the extra HBM pad pass entirely.
    x_p = x if (Bp == B and Kp == Fin) else jnp.pad(x, ((0, Bp - B), (0, Kp - Fin)))
    w_p = w if (Np == Fout and Kp == Fin) else jnp.pad(w, ((0, Np - Fout), (0, Kp - Fin)))
    b_p = b.reshape(1, Fout)
    if Np != Fout:
        b_p = jnp.pad(b_p, ((0, 0), (0, Np - Fout)))

    if use_bf16_operands and x_p.dtype != jnp.bfloat16:
        x_p = x_p.astype(jnp.bfloat16)
        w_p = w_p.astype(jnp.bfloat16)

    grid = (Bp // tm, Np // tn, Kp // tk)
    m_blocks, n_blocks, _ = grid

    # Tiled-traffic estimate: x is re-read once per N block, W once per M block.
    cost = pl.CostEstimate(
        flops=2 * Bp * Kp * Np,
        bytes_accessed=(op_itemsize * (Bp * Kp * n_blocks + Np * Kp * m_blocks)
                        + out_itemsize * Bp * Np
                        + 4 * Np * m_blocks),
        transcendentals=0,
    )

    if jnp.dtype(out_dtype) == jnp.float32:
        kernel = functools.partial(_linear_kernel_inplace, cast_bf16=use_bf16_operands)
        scratch_shapes = []
    else:
        kernel = functools.partial(_linear_kernel_scratch, cast_bf16=use_bf16_operands)
        scratch_shapes = [pltpu.VMEM((tm, tn), jnp.float32)]

    # Explicit scoped-VMEM limit sized from the footprint (v5e default is only
    # 16 MiB); capped so the plan is safe on v7x's 64 MiB physical VMEM.
    vmem_limit = min(48 << 20, max(16 << 20, int(fp_bytes) + (8 << 20)))

    y_p = pl.pallas_call(
        kernel,
        out_shape=jax.ShapeDtypeStruct((Bp, Np), out_dtype),
        grid_spec=pltpu.PrefetchScalarGridSpec(
            num_scalar_prefetch=0,
            grid=grid,
            in_specs=[
                pl.BlockSpec((tm, tk), lambda i, j, k: (i, k)),   # x tile
                pl.BlockSpec((tn, tk), lambda i, j, k: (j, k)),   # W tile (row-major)
                pl.BlockSpec((1, tn), lambda i, j, k: (0, j)),    # bias tile
            ],
            out_specs=pl.BlockSpec((tm, tn), lambda i, j, k: (i, j)),
            scratch_shapes=scratch_shapes,
        ),
        compiler_params=pltpu.CompilerParams(
            dimension_semantics=("parallel", "parallel", "arbitrary"),
            vmem_limit_bytes=vmem_limit,
        ),
        cost_estimate=cost,
    )(x_p, w_p, b_p)

    if Bp == B and Np == Fout:
        return y_p
    return y_p[:B, :Fout]


def linear_forward_auto(x, w, b, *, min_padded_macs=1 << 24, max_pad_waste=4.0):
    """Dispatch gate: tiny layers or shapes with heavy padding waste (e.g. Fin or
    Fout far below a 128 multiple) are strictly faster as plain XLA."""
    B, Fin = x.shape
    Fout = w.shape[0]
    Bp = _round_up(B, 8)
    Kp = _round_up(Fin, 128)
    Np = _round_up(Fout, 128)
    padded_macs = Bp * Kp * Np
    pad_waste = padded_macs / max(1, B * Fin * Fout)
    if padded_macs < min_padded_macs or pad_waste > max_pad_waste:
        return x @ w.T + b
    return linear_forward(x, w, b)


def init_params(key, in_features=1, out_features=1):
    # Mimics torch.nn.Linear default init: uniform(-1/sqrt(fan_in), +1/sqrt(fan_in)).
    kw, kb = jax.random.split(key)
    bound = 1.0 / jnp.sqrt(jnp.float32(in_features))
    w = jax.random.uniform(kw, (out_features, in_features), jnp.float32, -bound, bound)
    b = jax.random.uniform(kb, (out_features,), jnp.float32, -bound, bound)
    return w, b


if __name__ == "__main__":
    key = jax.random.PRNGKey(0)
    kx, kp, kw2, kb2 = jax.random.split(key, 4)

    # Shapes implied by the module: nn.Linear(1, 1) applied to a (batch, 1) input.
    batch, in_features, out_features = 8, 1, 1
    x = jax.random.normal(kx, (batch, in_features), jnp.float32)
    w, b = init_params(kp, in_features, out_features)

    # Exercise the Pallas kernel directly (linear_forward_auto would route this
    # tiny shape to plain XLA in production use).
    y = linear_forward(x, w, b)
    jax.block_until_ready(y)
    y_ref = x @ w.T + b
    assert y.shape == y_ref.shape, "shape mismatch vs reference"
    assert jnp.allclose(y, y_ref, atol=1e-5, rtol=1e-5), "mismatch vs reference"

    # Also exercise a larger, tile-aligned shape: in-place f32 accumulation,
    # multi-block N grid (megacore split), no padding path.
    x2 = jax.random.normal(kx, (256, 512), jnp.float32)
    w2 = jax.random.normal(kw2, (384, 512), jnp.float32) * 0.05
    b2 = jax.random.normal(kb2, (384,), jnp.float32)
    y2 = linear_forward(x2, w2, b2)
    jax.block_until_ready(y2)
    y2_ref = x2 @ w2.T + b2
    assert jnp.allclose(y2, y2_ref, atol=5e-2, rtol=5e-2), "mismatch vs reference (large)"

    print("KERNEL_OK")
</pallas_src>

<mosaic_0001>
module attributes {stable_mosaic.version = 11 : i64} {
  func.func @_linear_kernel_inplace(%arg0: i32, %arg1: i32, %arg2: i32, %arg3: memref<8x128xf32, #tpu.memory_space<vmem>>, %arg4: memref<128x128xf32, #tpu.memory_space<vmem>>, %arg5: memref<1x128xf32, #tpu.memory_space<vmem>>, %arg6: memref<8x128xf32, #tpu.memory_space<vmem>>) attributes {dimension_semantics = [#tpu.dimension_semantics<parallel>, #tpu.dimension_semantics<parallel>, #tpu.dimension_semantics<arbitrary>], iteration_bounds = array<i64: 1, 1, 1>, scalar_prefetch = 0 : i64, scratch_operands = 0 : i64, tpu.core_type = #tpu.core_type<tc>, window_params = [{transform_indices = @transform_0, window_bounds = array<i64: 8, 128>}, {transform_indices = @transform_1, window_bounds = array<i64: 128, 128>}, {transform_indices = @transform_2, window_bounds = array<i64: 1, 128>}, {transform_indices = @transform_3, window_bounds = array<i64: 8, 128>}]} {
    %c0_i32 = arith.constant 0 : i32
    %0 = arith.cmpi eq, %arg2, %c0_i32 : i32
    %1 = arith.extui %0 : i1 to i32
    %c0_i32_0 = arith.constant 0 : i32
    %2 = arith.cmpi ne, %1, %c0_i32_0 : i32
    scf.if %2 {
      %cst_10 = arith.constant 0.000000e+00 : f32
      %12 = vector.broadcast %cst_10 : f32 to vector<8x128xf32>
      %c0_11 = arith.constant 0 : index
      %c0_12 = arith.constant 0 : index
      %13 = vector.load %arg6[%c0_11, %c0_12] : memref<8x128xf32, #tpu.memory_space<vmem>>, vector<8x128xf32>
      tpu.vector_store %arg6[%c0_11, %c0_12], %12 {strides = array<i32>} : memref<8x128xf32, #tpu.memory_space<vmem>>, vector<8x128xf32>,
    } else {
    }
    %c0 = arith.constant 0 : index
    %c0_1 = arith.constant 0 : index
    %3 = vector.load %arg3[%c0, %c0_1] : memref<8x128xf32, #tpu.memory_space<vmem>>, vector<8x128xf32>
    %c0_2 = arith.constant 0 : index
    %c0_3 = arith.constant 0 : index
    %4 = vector.load %arg4[%c0_2, %c0_3] : memref<128x128xf32, #tpu.memory_space<vmem>>, vector<128x128xf32>
    %c0_4 = arith.constant 0 : index
    %c0_5 = arith.constant 0 : index
    %5 = vector.load %arg6[%c0_4, %c0_5] : memref<8x128xf32, #tpu.memory_space<vmem>>, vector<8x128xf32>
    %cst = arith.constant dense<0.000000e+00> : vector<8x128xf32>
    %6 = tpu.matmul %3, %4, %cst {dimension_numbers = #tpu.dot_dimension_numbers<[1], [1], [0], [0], [0, 0, 1, 0], [], []>} : vector<8x128xf32>, vector<128x128xf32>, vector<8x128xf32> -> vector<8x128xf32>
    %7 = arith.addf %5, %6 : vector<8x128xf32>
    %c0_6 = arith.constant 0 : index
    %c0_7 = arith.constant 0 : index
    %8 = vector.load %arg6[%c0_6, %c0_7] : memref<8x128xf32, #tpu.memory_space<vmem>>, vector<8x128xf32>
    tpu.vector_store %arg6[%c0_6, %c0_7], %7 {strides = array<i32>} : memref<8x128xf32, #tpu.memory_space<vmem>>, vector<8x128xf32>,
    %c0_i32_8 = arith.constant 0 : i32
    %9 = arith.cmpi eq, %arg2, %c0_i32_8 : i32
    %10 = arith.extui %9 : i1 to i32
    %c0_i32_9 = arith.constant 0 : i32
    %11 = arith.cmpi ne, %10, %c0_i32_9 : i32
    scf.if %11 {
      %c0_10 = arith.constant 0 : index
      %c0_11 = arith.constant 0 : index
      %12 = vector.load %arg6[%c0_10, %c0_11] : memref<8x128xf32, #tpu.memory_space<vmem>>, vector<8x128xf32>
      %c0_12 = arith.constant 0 : index
      %c0_13 = arith.constant 0 : index
      %13 = vector.load %arg5[%c0_12, %c0_13] : memref<1x128xf32, #tpu.memory_space<vmem>>, vector<1x128xf32>
      %14 = vector.broadcast %13 : vector<1x128xf32> to vector<8x128xf32>
      %15 = arith.addf %12, %14 : vector<8x128xf32>
      %c0_14 = arith.constant 0 : index
      %c0_15 = arith.constant 0 : index
      %16 = vector.load %arg6[%c0_14, %c0_15] : memref<8x128xf32, #tpu.memory_space<vmem>>, vector<8x128xf32>
      tpu.vector_store %arg6[%c0_14, %c0_15], %15 {strides = array<i32>} : memref<8x128xf32, #tpu.memory_space<vmem>>, vector<8x128xf32>,
    } else {
    }
    return
  }
  func.func @transform_0(%arg0: i32, %arg1: i32, %arg2: i32) -> (i32, i32) {
    %c0_i32 = arith.constant 0 : i32
    return %arg0, %arg2 : i32, i32
  }
  func.func @transform_1(%arg0: i32, %arg1: i32, %arg2: i32) -> (i32, i32) {
    %c0_i32 = arith.constant 0 : i32
    return %arg1, %arg2 : i32, i32
  }
  func.func @transform_2(%arg0: i32, %arg1: i32, %arg2: i32) -> (i32, i32) {
    %c0_i32 = arith.constant 0 : i32
    %c0_i32_0 = arith.constant 0 : i32
    return %c0_i32, %arg1 : i32, i32
  }
  func.func @transform_3(%arg0: i32, %arg1: i32, %arg2: i32) -> (i32, i32) {
    %c0_i32 = arith.constant 0 : i32
    return %arg0, %arg1 : i32, i32
  }
}

</mosaic_0001>

<bundles_post_ra>
// kernel: linear_forward.1
= control target key start
LH: loop header
LB: loop body
LE: loop exit
PB: predicated region body
PF: predicated region fallthrough
CT: control target
= control target key end

     0   :  { %v181_v0 = vmov 0.0   ;;  %vm182_vm0 = vmmov 0   ;;  %s260_s1 = inlined_call_operand.vmem [shape: f32[128,128], index: 1, kind: input, shape index: {}]   ;;  %s261_s0 = inlined_call_operand.vmem [shape: f32[8,128], index: 0, kind: input, shape index: {}]   ;;  %s262_s2 = inlined_call_operand.vmem [shape: f32[1,128], index: 2, kind: input, shape index: {}]   ;;  %s263_s3 = inlined_call_operand.vmem [shape: f32[8,128], index: 3, kind: output, shape index: {}]  }
   0x1   :  { %144 = vmatprep.subr.mxu0 %v181_v0  ;;  %v35_v1 = vld [vmem:[%s260_s1 + $0x78] sm:$0xff]  ;;  %176 = vmatprep.mubr.msk.f32.mxu0 %vm182_vm0, %v181_v0  ;;  %v34_v2 = vld [vmem:[%s260_s1 + $0x70] sm:$0xff]  ;;  %v33_v3 = vld [vmem:[%s260_s1 + $0x68] sm:$0xff] }
   0x2   :  { %145 = vmatpush3.xpose.msra.mxu0 %v35_v1  ;;  %v32_v4 = vld [vmem:[%s260_s1 + $0x60] sm:$0xff]  ;;  %v31_v5 = vld [vmem:[%s260_s1 + $0x58] sm:$0xff]  ;;  %v30_v6 = vld [vmem:[%s260_s1 + $0x50] sm:$0xff] }
   0x3   :  { %146 = vmatprep.subr.mxu0 %v181_v0  ;;  %v29_v7 = vld [vmem:[%s260_s1 + $0x48] sm:$0xff]  ;;  %v28_v8 = vld [vmem:[%s260_s1 + $0x40] sm:$0xff]  ;;  %v27_v9 = vld [vmem:[%s260_s1 + $0x38] sm:$0xff] }
   0x4   :  { %v26_v10 = vld [vmem:[%s260_s1 + $0x30] sm:$0xff]  ;;  %v25_v11 = vld [vmem:[%s260_s1 + $0x28] sm:$0xff]  ;;  %v24_v12 = vld [vmem:[%s260_s1 + $0x20] sm:$0xff] }
   0x5   :  { %v23_v13 = vld [vmem:[%s260_s1 + $0x18] sm:$0xff]  ;;  %v22_v14 = vld [vmem:[%s260_s1 + $0x10] sm:$0xff]  ;;  %v21_v15 = vld [vmem:[%s260_s1 + $0x8] sm:$0xff] }
   0x6   :  { %147 = vmatpush3.xpose.msra.mxu0 %v34_v2  ;;  %v20_v16 = vld [vmem:[%s260_s1] sm:$0xff] }
   0x7   :  { %148 = vmatprep.subr.mxu0 %v181_v0  ;;  %v19_v17 = vld [vmem:[%s261_s0] sm:$0xff] }
   0x8   :  { %v126_v19 = vld [vmem:[%s262_s2] ss:$0 sm:$0xff] }
   0xa   :  { %149 = vmatpush3.xpose.msra.mxu0 %v33_v3 }
   0xb   :  { %150 = vmatprep.subr.mxu0 %v181_v0 }
   0xe   :  { %151 = vmatpush3.xpose.msra.mxu0 %v32_v4 }
   0xf   :  { %152 = vmatprep.subr.mxu0 %v181_v0 }
  0x12   :  { %153 = vmatpush3.xpose.msra.mxu0 %v31_v5 }
  0x13   :  { %154 = vmatprep.subr.mxu0 %v181_v0 }
  0x16   :  { %155 = vmatpush3.xpose.msra.mxu0 %v30_v6 }
  0x17   :  { %156 = vmatprep.subr.mxu0 %v181_v0 }
  0x1a   :  { %157 = vmatpush3.xpose.msra.mxu0 %v29_v7 }
  0x1b   :  { %158 = vmatprep.subr.mxu0 %v181_v0 }
  0x1e   :  { %159 = vmatpush3.xpose.msra.mxu0 %v28_v8 }
  0x1f   :  { %160 = vmatprep.subr.mxu0 %v181_v0 }
  0x22   :  { %161 = vmatpush3.xpose.msra.mxu0 %v27_v9 }
  0x23   :  { %162 = vmatprep.subr.mxu0 %v181_v0 }
  0x26   :  { %163 = vmatpush3.xpose.msra.mxu0 %v26_v10 }
  0x27   :  { %164 = vmatprep.subr.mxu0 %v181_v0 }
  0x2a   :  { %165 = vmatpush3.xpose.msra.mxu0 %v25_v11 }
  0x2b   :  { %166 = vmatprep.subr.mxu0 %v181_v0 }
  0x2e   :  { %167 = vmatpush3.xpose.msra.mxu0 %v24_v12 }
  0x2f   :  { %168 = vmatprep.subr.mxu0 %v181_v0 }
  0x32   :  { %169 = vmatpush3.xpose.msra.mxu0 %v23_v13 }
  0x33   :  { %170 = vmatprep.subr.mxu0 %v181_v0 }
  0x36   :  { %171 = vmatpush3.xpose.msra.mxu0 %v22_v14 }
  0x37   :  { %172 = vmatprep.subr.mxu0 %v181_v0 }
  0x3a   :  { %173 = vmatpush3.xpose.msra.mxu0 %v21_v15 }
  0x3b   :  { %174 = vmatprep.subr.mxu0 %v181_v0 }
  0x3e   :  { %175 = vmatpush3.xpose.msra.mxu0 %v20_v16 }
  0x41   :  { %177 = vmatmul.mubr.f32.vlgmr.msra.gmra.mxu0 %v19_v17 }
 0x101   :  { %v103_v18 = vpop.f32.mrf.mxu0 }
 0x102   :  { %v120_v21 = vadd.f32 %v126_v19, %v103_v18 }
 0x103   :  { %v178_v20 = vpop.f32.mrf.mxu0 }
 0x104   :  { %121 = vst [vmem:[%s263_s3] sm:$0xff] %v120_v21 }

</bundles_post_ra>
